<compile_context>
chip_gen: v7x
topology: tpu7x:2x2x1
jax: 0.10.0
libtpu: 0.0.40
codegen_flags: <defaults>
</compile_context>

<pallas_src>
import numpy as np
import jax
import jax.numpy as jnp
from jax.experimental import pallas as pl
from jax.experimental.pallas import tpu as pltpu

PYRAMIDS = [1, 2, 3, 6]
KTOT = sum(b * b for b in PYRAMIDS)   # 50 packed pooled columns
KPAD = 64                             # packed width padded to a lane-friendly size
NEG_FILL = -1e30                      # off-level fill; relu() zeroes these columns


# ---------------------------------------------------------------------------
# Exact linear operators for adaptive_avg_pool2d and
# F.interpolate(mode='bilinear', align_corners=True), matching PyTorch.
# ---------------------------------------------------------------------------
def pool_matrix_1d(bin_size, size):
    """(bin, size): row i averages x[floor(i*size/bin) : ceil((i+1)*size/bin)]."""
    M = np.zeros((bin_size, size), np.float32)
    for i in range(bin_size):
        s = (i * size) // bin_size
        e = -(-((i + 1) * size) // bin_size)  # ceil div
        M[i, s:e] = 1.0 / float(e - s)
    return M


def upsample_matrix_1d(bin_size, size):
    """(size, bin): align_corners=True bilinear interpolation weights."""
    M = np.zeros((size, bin_size), np.float32)
    if bin_size == 1:
        M[:, 0] = 1.0
        return M
    scale = (bin_size - 1) / (size - 1)
    for h in range(size):
        src = h * scale
        i0 = min(int(np.floor(src)), bin_size - 2)
        frac = src - i0
        M[h, i0] += 1.0 - frac
        M[h, i0 + 1] += frac
    return M


def build_packed_operators(H, W):
    """Packed operators for all pyramid levels.

    Pt : (HW, KPAD)   pooled_all = x @ Pt
    Up : (KPAD, HW)   out_all    = z @ Up
    offs : packed column offset of each level
    """
    HW = H * W
    Pt = np.zeros((HW, KPAD), np.float32)
    Up = np.zeros((KPAD, HW), np.float32)
    offs = []
    o = 0
    for b in PYRAMIDS:
        Ph, Pw = pool_matrix_1d(b, H), pool_matrix_1d(b, W)
        Uh, Uw = upsample_matrix_1d(b, H), upsample_matrix_1d(b, W)
        Kp = np.kron(Ph, Pw)            # (b*b, HW)   pooled = x @ Kp.T
        Ku = np.kron(Uh, Uw)            # (HW, b*b)   out    = z @ Ku.T
        Pt[:, o:o + b * b] = Kp.T
        Up[o:o + b * b, :] = Ku.T
        offs.append(o)
        o += b * b
    return Pt, Up, offs


# ---------------------------------------------------------------------------
# Pallas kernel.
# grid = (B, n_c + n_u):
#   steps [0, n_c)          : write pass-through rows, accumulate packed conv
#   steps [n_c, n_c + n_u)  : relu(acc + shift_masked) row-tile, packed upsample,
#                             write one new-channel row tile per step
# ---------------------------------------------------------------------------
def _make_ppm_kernel(n_c, block_c):
    def ppm_kernel(x_ref, pt_ref, up_ref, w_ref, sm_ref, o_ref, acc_ref):
        s = pl.program_id(1)

        @pl.when(s < n_c)
        def _conv_phase():
            @pl.when(s == 0)
            def _():
                acc_ref[...] = jnp.zeros_like(acc_ref)

            x = x_ref[0]                                   # (block_c, HW) f32
            # pass-through channels: single lane-dense store, no XLA concat
            o_ref[0] = x.astype(o_ref.dtype)
            # packed adaptive average pool for ALL levels -> (block_c, KPAD)
            pooled = jnp.dot(x.astype(jnp.bfloat16), pt_ref[...],
                             preferred_element_type=jnp.float32)
            # packed 1x1 conv (BN scale pre-folded), accumulate over channel tiles
            acc_ref[...] += jnp.dot(w_ref[...], pooled.astype(jnp.bfloat16),
                                    preferred_element_type=jnp.float32)

        @pl.when(s >= n_c)
        def _upsample_phase():
            start = pl.multiple_of((s - n_c) * block_c, block_c)
            # shift (BN) + level mask fused: off-level columns hold -1e30, so the
            # relu zeroes them and the packed upsample only sees its own level.
            z = jnp.maximum(acc_ref[pl.ds(start, block_c), :]
                            + sm_ref[pl.ds(start, block_c), :], 0.0)
            up = jnp.dot(z.astype(jnp.bfloat16), up_ref[...],
                         preferred_element_type=jnp.float32)  # (block_c, HW)
            o_ref[0] = up.astype(o_ref.dtype)

    return ppm_kernel


def pyramid_pooling_module(x, Wc, scale, shift, block_c=None, out_dtype=None):
    """x: (B, C, H, W); Wc: (L, Cout, C); scale/shift: (L, Cout, 1).

    Returns (B, C + L*Cout, H, W), matching the torch module with inference
    (running-stats) BatchNorm semantics folded into scale/shift.
    """
    B, C, H, W = x.shape
    L, Cout, _ = Wc.shape
    n_new = L * Cout
    HW = H * W
    out_dtype = x.dtype if out_dtype is None else out_dtype

    # channel tile: prefer large tiles (fewer per-step fixed overheads)
    if block_c is None:
        if C <= 512:
            block_c = C
        else:
            block_c = C
            for cand in (512, 256, 128):
                if C % cand == 0:
                    block_c = cand
                    break
    assert C % block_c == 0 and n_new % block_c == 0, "block_c must divide C and L*Cout"
    n_c = C // block_c
    n_u = n_new // block_c

    Pt_np, Up_np, offs = build_packed_operators(H, W)

    # Fold BN scale into the 1x1 conv weights; stack levels along output rows.
    Wall = (np.asarray(scale, np.float32) * np.asarray(Wc, np.float32)).reshape(n_new, C)

    # Fused shift + block-diagonal level mask over the packed pooled columns.
    sm = np.full((n_new, KPAD), NEG_FILL, np.float32)
    shift_np = np.asarray(shift, np.float32).reshape(L, Cout)
    for p, b in enumerate(PYRAMIDS):
        sm[p * Cout:(p + 1) * Cout, offs[p]:offs[p] + b * b] = shift_np[p][:, None]

    x_flat = x.reshape(B, C, HW)                       # free reshape, no cast/pad pass
    Pt = jnp.asarray(Pt_np, jnp.bfloat16)
    Up = jnp.asarray(Up_np, jnp.bfloat16)
    Wall_b = jnp.asarray(Wall, jnp.bfloat16)
    sm_j = jnp.asarray(sm)

    # VMEM footprint (double-buffered x / Wall / out blocks + resident operators)
    out_isz = np.dtype(out_dtype).itemsize
    fp = (2 * block_c * HW * x.dtype.itemsize
          + 2 * block_c * HW * out_isz
          + 2 * n_new * block_c * 2
          + HW * KPAD * 2 + KPAD * HW * 2
          + 2 * n_new * KPAD * 4)
    vmem_limit = int(min(max(fp * 3 // 2 + (4 << 20), 16 << 20), 64 << 20))

    kernel = _make_ppm_kernel(n_c, block_c)

    out = pl.pallas_call(
        kernel,
        out_shape=jax.ShapeDtypeStruct((B, C + n_new, HW), out_dtype),
        grid_spec=pltpu.PrefetchScalarGridSpec(
            num_scalar_prefetch=0,
            grid=(B, n_c + n_u),
            in_specs=[
                # x: re-use the last channel block during upsample steps (no re-DMA)
                pl.BlockSpec((1, block_c, HW),
                             lambda b, s: (b, jnp.minimum(s, n_c - 1), 0)),
                pl.BlockSpec((HW, KPAD), lambda b, s: (0, 0)),            # Pt
                pl.BlockSpec((KPAD, HW), lambda b, s: (0, 0)),            # Up
                pl.BlockSpec((n_new, block_c),
                             lambda b, s: (0, jnp.minimum(s, n_c - 1))),  # Wall
                pl.BlockSpec((n_new, KPAD), lambda b, s: (0, 0)),         # shift+mask
            ],
            out_specs=pl.BlockSpec((1, block_c, HW), lambda b, s: (b, s, 0)),
            scratch_shapes=[pltpu.VMEM((n_new, KPAD), jnp.float32)],
        ),
        compiler_params=pltpu.CompilerParams(
            dimension_semantics=("parallel", "arbitrary"),
            vmem_limit_bytes=vmem_limit),
    )(x_flat, Pt, Up, Wall_b, sm_j)

    return out.reshape(B, C + n_new, H, W)


# ---------------------------------------------------------------------------
# Plain-JAX f32 reference (per-level, exact operators) for correctness check.
# ---------------------------------------------------------------------------
def reference(x, Wc, scale, shift, H, W):
    B, C, _, _ = x.shape
    HW = H * W
    xf = x.reshape(B, C, HW)
    hi = jax.lax.Precision.HIGHEST
    feats = [xf]
    for p, b in enumerate(PYRAMIDS):
        Kp = jnp.asarray(np.kron(pool_matrix_1d(b, H), pool_matrix_1d(b, W)))
        Ku = jnp.asarray(np.kron(upsample_matrix_1d(b, H), upsample_matrix_1d(b, W)))
        pooled = jnp.einsum("bcm,km->bck", xf, Kp, precision=hi)
        z = jnp.einsum("oc,bck->bok", Wc[p], pooled, precision=hi)
        z = jnp.maximum(z * scale[p][None] + shift[p][None], 0.0)
        feats.append(jnp.einsum("bok,mk->bom", z, Ku, precision=hi))
    return jnp.concatenate(feats, axis=1).reshape(B, -1, H, W)


if __name__ == "__main__":
    def run_case(B, C, H, W, seed, block_c=None):
        L = len(PYRAMIDS)
        Cout = C // L
        n_new = L * Cout
        key = jax.random.PRNGKey(seed)
        k_x, k_w = jax.random.split(key)
        x = jax.random.normal(k_x, (B, C, H, W), dtype=jnp.float32)
        Wc = jax.random.normal(k_w, (L, Cout, C), dtype=jnp.float32) * 0.1

        # Synthetic inference BatchNorm parameters (folded scale/shift).
        idx = jnp.arange(n_new, dtype=jnp.float32).reshape(L, Cout) / n_new
        gamma, beta = 1.0 + 0.5 * idx, 0.5 * idx
        run_mean, run_var = 0.1 * idx, 1.0 + 0.2 * idx
        eps = 1e-5
        scale = (gamma / jnp.sqrt(run_var + eps))[..., None]               # (L,Cout,1)
        shift = (beta - run_mean * gamma / jnp.sqrt(run_var + eps))[..., None]

        out = pyramid_pooling_module(x, Wc, scale, shift, block_c=block_c)
        out = jax.block_until_ready(out)
        assert out.shape == (B, C + n_new, H, W)

        # Reference in f32 from the same bf16-rounded operands (kernel uses
        # bf16 matmul inputs with f32 accumulation).
        x_r = x.astype(jnp.bfloat16).astype(jnp.float32)
        W_r = Wc.astype(jnp.bfloat16).astype(jnp.float32)
        ref = reference(x_r, W_r, scale, shift, H, W)

        np.testing.assert_array_equal(np.asarray(out[:, :C]), np.asarray(x))
        np.testing.assert_allclose(np.asarray(out[:, C:]), np.asarray(ref[:, C:]),
                                   rtol=3e-2, atol=3e-2)

    run_case(2, 16, 16, 16, 0)                 # single channel step + single upsample step
    run_case(2, 256, 16, 16, 0, block_c=128)   # channel-tile accumulation + tiled upsample
    print("KERNEL_OK")
</pallas_src>

<mosaic_0001>
module attributes {stable_mosaic.version = 11 : i64} {
  func.func @ppm_kernel(%arg0: i32, %arg1: i32, %arg2: memref<1x16x256xf32, #tpu.memory_space<vmem>>, %arg3: memref<256x64xbf16, #tpu.memory_space<vmem>>, %arg4: memref<64x256xbf16, #tpu.memory_space<vmem>>, %arg5: memref<16x16xbf16, #tpu.memory_space<vmem>>, %arg6: memref<16x64xf32, #tpu.memory_space<vmem>>, %arg7: memref<1x16x256xf32, #tpu.memory_space<vmem>>, %arg8: memref<16x64xf32, #tpu.memory_space<vmem>>) attributes {dimension_semantics = [#tpu.dimension_semantics<parallel>, #tpu.dimension_semantics<arbitrary>], iteration_bounds = array<i64: 2, 2>, scalar_prefetch = 0 : i64, scratch_operands = 1 : i64, tpu.core_type = #tpu.core_type<tc>, window_params = [{transform_indices = @transform_0, window_bounds = array<i64: 1, 16, 256>}, {pipeline_mode = #tpu.pipeline_mode<synchronous>, transform_indices = @transform_1, window_bounds = array<i64: 256, 64>}, {pipeline_mode = #tpu.pipeline_mode<synchronous>, transform_indices = @transform_2, window_bounds = array<i64: 64, 256>}, {transform_indices = @transform_3, window_bounds = array<i64: 16, 16>}, {pipeline_mode = #tpu.pipeline_mode<synchronous>, transform_indices = @transform_4, window_bounds = array<i64: 16, 64>}, {transform_indices = @transform_5, window_bounds = array<i64: 1, 16, 256>}]} {
    %c1_i32 = arith.constant 1 : i32
    %0 = arith.cmpi slt, %arg1, %c1_i32 : i32
    %1 = arith.extui %0 : i1 to i32
    %c0_i32 = arith.constant 0 : i32
    %2 = arith.cmpi ne, %1, %c0_i32 : i32
    scf.if %2 {
      %c0_i32_2 = arith.constant 0 : i32
      %6 = arith.cmpi eq, %arg1, %c0_i32_2 : i32
      %7 = arith.extui %6 : i1 to i32
      %c0_i32_3 = arith.constant 0 : i32
      %8 = arith.cmpi ne, %7, %c0_i32_3 : i32
      scf.if %8 {
        %cst_18 = arith.constant 0.000000e+00 : f32
        %23 = vector.broadcast %cst_18 : f32 to vector<16x64xf32>
        %c0_19 = arith.constant 0 : index
        %c0_20 = arith.constant 0 : index
        %24 = vector.load %arg8[%c0_19, %c0_20] : memref<16x64xf32, #tpu.memory_space<vmem>>, vector<16x64xf32>
        tpu.vector_store %arg8[%c0_19, %c0_20], %23 {strides = array<i32>} : memref<16x64xf32, #tpu.memory_space<vmem>>, vector<16x64xf32>,
      } else {
      }
      %c0 = arith.constant 0 : index
      %c0_4 = arith.constant 0 : index
      %c0_5 = arith.constant 0 : index
      %9 = vector.load %arg2[%c0, %c0_4, %c0_5] : memref<1x16x256xf32, #tpu.memory_space<vmem>>, vector<1x16x256xf32>
      %10 = vector.shape_cast %9 : vector<1x16x256xf32> to vector<16x256xf32>
      %c0_6 = arith.constant 0 : index
      %c0_7 = arith.constant 0 : index
      %c0_8 = arith.constant 0 : index
      %11 = vector.load %arg7[%c0_6, %c0_7, %c0_8] : memref<1x16x256xf32, #tpu.memory_space<vmem>>, vector<1x16x256xf32>
      %12 = vector.shape_cast %11 : vector<1x16x256xf32> to vector<16x256xf32>
      %13 = vector.shape_cast %10 : vector<16x256xf32> to vector<1x16x256xf32>
      tpu.vector_store %arg7[%c0_6, %c0_7, %c0_8], %13 {strides = array<i32>} : memref<1x16x256xf32, #tpu.memory_space<vmem>>, vector<1x16x256xf32>,
      %14 = arith.truncf %10 : vector<16x256xf32> to vector<16x256xbf16>
      %c0_9 = arith.constant 0 : index
      %c0_10 = arith.constant 0 : index
      %15 = vector.load %arg3[%c0_9, %c0_10] : memref<256x64xbf16, #tpu.memory_space<vmem>>, vector<256x64xbf16>
      %cst = arith.constant dense<0.000000e+00> : vector<16x64xf32>
      %16 = tpu.matmul %14, %15, %cst {dimension_numbers = #tpu.dot_dimension_numbers<[1], [0], [0], [1], [0, 0, 1, 1], [], []>} : vector<16x256xbf16>, vector<256x64xbf16>, vector<16x64xf32> -> vector<16x64xf32>
      %c0_11 = arith.constant 0 : index
      %c0_12 = arith.constant 0 : index
      %17 = vector.load %arg8[%c0_11, %c0_12] : memref<16x64xf32, #tpu.memory_space<vmem>>, vector<16x64xf32>
      %c0_13 = arith.constant 0 : index
      %c0_14 = arith.constant 0 : index
      %18 = vector.load %arg5[%c0_13, %c0_14] : memref<16x16xbf16, #tpu.memory_space<vmem>>, vector<16x16xbf16>
      %19 = arith.truncf %16 : vector<16x64xf32> to vector<16x64xbf16>
      %cst_15 = arith.constant dense<0.000000e+00> : vector<16x64xf32>
      %20 = tpu.matmul %18, %19, %cst_15 {dimension_numbers = #tpu.dot_dimension_numbers<[1], [0], [0], [1], [0, 0, 1, 1], [], []>} : vector<16x16xbf16>, vector<16x64xbf16>, vector<16x64xf32> -> vector<16x64xf32>
      %21 = arith.addf %17, %20 : vector<16x64xf32>
      %c0_16 = arith.constant 0 : index
      %c0_17 = arith.constant 0 : index
      %22 = vector.load %arg8[%c0_16, %c0_17] : memref<16x64xf32, #tpu.memory_space<vmem>>, vector<16x64xf32>
      tpu.vector_store %arg8[%c0_16, %c0_17], %21 {strides = array<i32>} : memref<16x64xf32, #tpu.memory_space<vmem>>, vector<16x64xf32>,
    } else {
    }
    %c1_i32_0 = arith.constant 1 : i32
    %3 = arith.cmpi sge, %arg1, %c1_i32_0 : i32
    %4 = arith.extui %3 : i1 to i32
    %c0_i32_1 = arith.constant 0 : i32
    %5 = arith.cmpi ne, %4, %c0_i32_1 : i32
    scf.if %5 {
      %c1_i32_2 = arith.constant 1 : i32
      %6 = arith.subi %arg1, %c1_i32_2 : i32
      %c16_i32 = arith.constant 16 : i32
      %7 = arith.muli %6, %c16_i32 : i32
      %8 = tpu.assume_multiple %7, 16 : i32
      %9 = arith.index_cast %8 : i32 to index
      %c0 = arith.constant 0 : index
      %10 = vector.load %arg8[%9, %c0] : memref<16x64xf32, #tpu.memory_space<vmem>>, vector<16x64xf32>
      %11 = arith.index_cast %8 : i32 to index
      %c0_3 = arith.constant 0 : index
      %12 = vector.load %arg6[%11, %c0_3] : memref<16x64xf32, #tpu.memory_space<vmem>>, vector<16x64xf32>
      %13 = arith.addf %10, %12 : vector<16x64xf32>
      %cst = arith.constant 0.000000e+00 : f32
      %14 = vector.broadcast %cst : f32 to vector<16x64xf32>
      %15 = arith.maximumf %13, %14 : vector<16x64xf32>
      %16 = arith.truncf %15 : vector<16x64xf32> to vector<16x64xbf16>
      %c0_4 = arith.constant 0 : index
      %c0_5 = arith.constant 0 : index
      %17 = vector.load %arg4[%c0_4, %c0_5] : memref<64x256xbf16, #tpu.memory_space<vmem>>, vector<64x256xbf16>
      %cst_6 = arith.constant dense<0.000000e+00> : vector<16x256xf32>
      %18 = tpu.matmul %16, %17, %cst_6 {dimension_numbers = #tpu.dot_dimension_numbers<[1], [0], [0], [1], [0, 0, 1, 1], [], []>} : vector<16x64xbf16>, vector<64x256xbf16>, vector<16x256xf32> -> vector<16x256xf32>
      %c0_7 = arith.constant 0 : index
      %c0_8 = arith.constant 0 : index
      %c0_9 = arith.constant 0 : index
      %19 = vector.load %arg7[%c0_7, %c0_8, %c0_9] : memref<1x16x256xf32, #tpu.memory_space<vmem>>, vector<1x16x256xf32>
      %20 = vector.shape_cast %19 : vector<1x16x256xf32> to vector<16x256xf32>
      %21 = vector.shape_cast %18 : vector<16x256xf32> to vector<1x16x256xf32>
      tpu.vector_store %arg7[%c0_7, %c0_8, %c0_9], %21 {strides = array<i32>} : memref<1x16x256xf32, #tpu.memory_space<vmem>>, vector<1x16x256xf32>,
    } else {
    }
    return
  }
  func.func @transform_0(%arg0: i32, %arg1: i32) -> (i32, i32, i32) {
    %c0_i32 = arith.constant 0 : i32
    %0 = arith.minsi %arg1, %c0_i32 : i32
    %c0_i32_0 = arith.constant 0 : i32
    %c0_i32_1 = arith.constant 0 : i32
    return %arg0, %0, %c0_i32_0 : i32, i32, i32
  }
  func.func @transform_1(%arg0: i32, %arg1: i32) -> (i32, i32) {
    %c0_i32 = arith.constant 0 : i32
    %c0_i32_0 = arith.constant 0 : i32
    %c0_i32_1 = arith.constant 0 : i32
    return %c0_i32, %c0_i32_0 : i32, i32
  }
  func.func @transform_2(%arg0: i32, %arg1: i32) -> (i32, i32) {
    %c0_i32 = arith.constant 0 : i32
    %c0_i32_0 = arith.constant 0 : i32
    %c0_i32_1 = arith.constant 0 : i32
    return %c0_i32, %c0_i32_0 : i32, i32
  }
  func.func @transform_3(%arg0: i32, %arg1: i32) -> (i32, i32) {
    %c0_i32 = arith.constant 0 : i32
    %0 = arith.minsi %arg1, %c0_i32 : i32
    %c0_i32_0 = arith.constant 0 : i32
    %c0_i32_1 = arith.constant 0 : i32
    return %c0_i32_0, %0 : i32, i32
  }
  func.func @transform_4(%arg0: i32, %arg1: i32) -> (i32, i32) {
    %c0_i32 = arith.constant 0 : i32
    %c0_i32_0 = arith.constant 0 : i32
    %c0_i32_1 = arith.constant 0 : i32
    return %c0_i32, %c0_i32_0 : i32, i32
  }
  func.func @transform_5(%arg0: i32, %arg1: i32) -> (i32, i32, i32) {
    %c0_i32 = arith.constant 0 : i32
    %c0_i32_0 = arith.constant 0 : i32
    return %arg0, %arg1, %c0_i32 : i32, i32, i32
  }
}

</mosaic_0001>

<bundles_post_ra>
// kernel: tpu_custom_call.1
= control target key start
LH: loop header
LB: loop body
LE: loop exit
PB: predicated region body
PF: predicated region fallthrough
CT: control target
= control target key end

     0   :  { %10 = vsyncpa [#allocation4], 0  ;;  %s1356_s0 = inlined_call_operand.vmem [shape: f32[2,16,256], index: 0, kind: input, shape index: {}]   ;;  %s1357_s1 = inlined_call_operand.vmem [shape: bf16[256,64], index: 1, kind: input, shape index: {}]   ;;  %s1358_s2 = inlined_call_operand.vmem [shape: bf16[64,256], index: 2, kind: input, shape index: {}]   ;;  %s1359_s3 = inlined_call_operand.vmem [shape: bf16[16,16], index: 3, kind: input, shape index: {}]   ;;  %s1360_s4 = inlined_call_operand.vmem [shape: f32[16,64], index: 4, kind: input, shape index: {}]   ;;  %s1361_s5 = inlined_call_operand.hbm [shape: f32[2,32,256], index: 5, kind: output, shape index: {}]  }
   0x1   :  { %12 = vsyncpa [#allocation4 + $0x1], 0  ;;  %s1110_s18 = smov 0   ;;  %s1112_s19 = smov 0  }
   0x2   :  { %s1114_s20 = smov 0   ;;  %s1116_s21 = smov 0  }
   0x3   :  { %s1118_s22 = smov 0   ;;  %s1120_s23 = smov 0  }
   0x4   :  { %s1122_s24 = smov 0   ;;  %s1124_s25 = smov 0  }
   0x5 LB: > { %1367 = sst [smem:[#allocation6_spill]] %s1063_s23  ;;  %s787_s26 = sadd.s32 4294967295, %s1071_s25   ;;  %s1071_s25 = sphi %s1124_s25, %s18_s25   ;;  %s1067_s24 = sphi %s1122_s24, %s1377_s24   ;;  %s1063_s23 = sphi %s1120_s23, %s1376_s23   ;;  %s1059_s22 = sphi %s1118_s22, %s1375_s22   ;;  %s1055_s21 = sphi %s1116_s21, %s1374_s21   ;;  %s1051_s20 = sphi %s1114_s20, %s1380_s20   ;;  %s1047_s19 = sphi %s1112_s19, %s1379_s19   ;;  %s1043_s18 = sphi %s1110_s18, %s1378_s18  }
   0x6   : > { %1368 = sst [smem:[#allocation7_spill]] %s1067_s24  ;;  %s788_s27 = sadd.s32 4294967294, %s1071_s25  }
   0x7   : > { %s27_s28 = sadd.s32 1, %s1063_s23  ;;  %s30_s29 = sadd.s32 1, %s1067_s24 }
   0x8   : > { %p28_p0 = scmp.ge.s32.totalorder %s27_s28, 2  ;;  %p174_p1 = scmp.ne.s32.totalorder %s1051_s20, %s1047_s19 }
   0x9   : > { %p175_p2 = scmp.eq.s32.totalorder %s787_s26, 3  ;;  %p180_p5 = scmp.ne.s32.totalorder %s1047_s19, %s1043_s18 }
   0xa   : > { %s1382_s28 = smov (%p28_p0, %s27_s28), 0  ;;  %s1384_s29 = smov (!%p28_p0, %s30_s29), %s1067_s24 }
   0xb   : > { %1369 = sst [smem:[#allocation8_spill]] %s1382_s28  ;;  %s160_s30 = ssub.s32 %s1063_s23, %s1382_s28 }
   0xc   : > { %p1161_p3 = por %p175_p2, %p174_p1  ;;  %p32_p4 = scmp.ge.s32.totalorder %s1384_s29, 2 }
   0xd   : > { %p181_p6 = scmp.eq.s32.totalorder %s788_s27, 3  ;;  %p791_p7 = scmp.ge.s32.totalorder %s1071_s25, 1 }
   0xe   : > { %s1386_s29 = smov (%p32_p4, %s1384_s29), 0  ;;  %p237_p9 = scmp.lt.s32.totalorder %s1071_s25, 5 }
   0xf   : > { %1371 = sst [smem:[#allocation9_spill]] %s1386_s29  ;;  %p1170_p8 = por %p181_p6, %p180_p5 }
  0x10   : > { %s159_s8 = ssub.s32 %s1067_s24, %s1386_s29  ;;  %s164_s9 = sadd.s32 1, %s1051_s20 }
  0x11   : > { %s161_s10 = sor.u32 %s160_s30, %s159_s8  ;;  %p238_p10 = pnand %p791_p7, %p237_p9 }
  0x12   : > { %p162_p11 = scmp.eq.s32.totalorder %s161_s10, 0  ;;  %s1365_s12 = sand.u32 (!%p238_p10), 1, %s1047_s19  }
  0x13   : > { %241 = sbr.rel (%p238_p10) target bundleno = 777 (0x309), region = 40  ;;  %p278_p12 = scmp.lt.s32.totalorder (!%p238_p10), %s1055_s21, 0 }
  0x14   : > { %s1179_s11 = scalar_select %p162_p11, %s1051_s20, %s164_s9  }
  0x15   : > { %s792_s13 = sshll.u32 (!%p238_p10), %s1365_s12, 5  ;;  %p281_p13 = scmp.lt.s32.totalorder (!%p238_p10), %s1059_s22, 1 }
  0x16   : > { %s1198_s23 = scalar_lea.vmem (!%p238_p10), [#allocation3], %s792_s13  ;;  %p801_p1 = scmp.ge.s32.totalorder (!%p238_p10), %s1055_s21, 1 }
  0x1a   : > { %s279_s14 = scalar_select %p278_p12, %s1055_s21, 0 }
  0x1b   : > { %s282_s15 = scalar_select %p281_p13, %s1059_s22, 1 }
  0x1c   : > { %s793_s16 = sshll.u32 %s279_s14, 1  ;;  %s1388_s14 = smov (!%p278_p12, %s279_s14), 0 }
  0x1d   : > { %p283_p0 = scmp.lt.s32.totalorder %s793_s16, 1  ;;  %s795_s17 = sshll.u32 %s282_s15, 2 }
  0x1e   : > { %s800_s26 = sshll.u32 %s1388_s14, 2  ;;  %306 = sbr.rel (%p801_p1) target bundleno = 516 (0x204), region = 44 }
  0x1f   : > { %s1390_s16 = smov (!%p283_p0, %s793_s16), 1  ;;  %s1191_s9 = scalar_lea.vmem %s1359_s3, %s800_s26 }
  0x20   : > { %s794_s27 = sshll.u32 %s1390_s16, 1  ;;  %p802_p2 = scmp.ne.s32.totalorder (!%p801_p1), %s1055_s21, 0 }
  0x21   : > { %s287_s10 = sadd.s32 %s795_s17, %s794_s27 }
  0x22   : > { %s796_s29 = sshll.u32 %s287_s10, 3 }
  0x23   : > { %s1196_s12 = scalar_lea.vmem %s1356_s0, %s796_s29 }
  0x25   : > { %310 = sbr.rel (%p802_p2) target bundleno = 44 (0x2c), region = 48  ;;  %vm311_vm0 = vcmask (!%p802_p2), 523264   ;;  %v1073_v0 = vmov (!%p802_p2), 0.0  }
  0x26   : > { %312 = vst.msk [vmem:[#allocation2] sm:$0xff] (!%p802_p2), %vm311_vm0, %v1073_v0  ;;  %313 = vst.msk [vmem:[#allocation2 + $0x8] sm:$0xff] (!%p802_p2), %vm311_vm0, %v1073_v0 }
  0x2c PF: > { %v948_v1 = vld [vmem:[%s1357_s1 + $0x40] sm:$0xff]   ;;  %v950_v3 = vld [vmem:[%s1357_s1 + $0x48] sm:$0xff]   ;;  %v952_v5 = vld [vmem:[%s1357_s1 + $0x50] sm:$0xff]   ;;  %v1074_v23 = vmov 0.0   ;;  %vm1075_vm1 = vmmov 0   ;;  %vm503_vm2 = vcmask 130048  }
  0x2d   : > { %v949_v2 = vld [vmem:[%s1357_s1] sm:$0xff]   ;;  %841 = vmatprep.subr.bf16.mxu0 %v948_v1  ;;  %v951_v4 = vld [vmem:[%s1357_s1 + $0x8] sm:$0xff]   ;;  %v953_v6 = vld [vmem:[%s1357_s1 + $0x10] sm:$0xff]   ;;  %865 = vmatprep.subr.bf16.mxu1 %v1074_v23  ;;  %vm550_vm3 = vcmask 523264  }
  0x2e   : > { %842 = vmatpush3.bf16.msra.mxu0 %v949_v2  ;;  %v954_v7 = vld [vmem:[%s1357_s1 + $0x58] sm:$0xff]   ;;  %v956_v9 = vld [vmem:[%s1357_s1 + $0x60] sm:$0xff]   ;;  %v958_v11 = vld [vmem:[%s1357_s1 + $0x68] sm:$0xff]   ;;  %867 = vmatprep.mubr.msk.bf16.mxu1 %vm1075_vm1, %v1074_v23 }
  0x2f   : > { %843 = vmatprep.subr.bf16.mxu0 %v950_v3  ;;  %v955_v8 = vld [vmem:[%s1357_s1 + $0x18] sm:$0xff]   ;;  %v957_v10 = vld [vmem:[%s1357_s1 + $0x20] sm:$0xff]   ;;  %v315_v12 = vld [vmem:[%s1196_s12 + $0x8] sm:$0xff] }
  0x30   : > { %v317_v13 = vld [vmem:[%s1196_s12 + $0x18] sm:$0xff]  ;;  %v314_v14 = vld [vmem:[%s1196_s12] sm:$0xff]  ;;  %319 = vst [vmem:[%s1198_s23 + $0x8] sm:$0xff] %v315_v12  ;;  %v316_v16 = vld [vmem:[%s1196_s12 + $0x10] sm:$0xff] }
  0x31   : > { %321 = vst [vmem:[%s1198_s23 + $0x18] sm:$0xff] %v317_v13  ;;  %v323_v15 = vpack.c.bf16 %v317_v13, %v315_v12  ;;  %318 = vst [vmem:[%s1198_s23] sm:$0xff] %v314_v14  ;;  %v959_v17 = vld [vmem:[%s1357_s1 + $0x28] sm:$0xff]   ;;  %v960_v18 = vld [vmem:[%s1357_s1 + $0x70] sm:$0xff]   ;;  %v322_v22 = vpack.c.bf16 %v316_v16, %v314_v14 }
  0x32   : > { %844 = vmatpush3.bf16.msra.mxu0 %v951_v4  ;;  %320 = vst [vmem:[%s1198_s23 + $0x10] sm:$0xff] %v316_v16  ;;  %v961_v19 = vld [vmem:[%s1357_s1 + $0x30] sm:$0xff]   ;;  %v962_v20 = vld [vmem:[%s1357_s1 + $0x78] sm:$0xff]   ;;  %v964_v31 = vld [vmem:[%s1191_s9] sm:$0xff]  }
  0x33   : > { %845 = vmatprep.subr.bf16.mxu0 %v952_v5  ;;  %484 = vmatprep.mubr.bf16.mxu0 %v323_v15  ;;  %v963_v21 = vld [vmem:[%s1357_s1 + $0x38] sm:$0xff]   ;;  %v493_v32 = vld [vmem:[#allocation2] sm:$0xff]  ;;  %v494_v34 = vld [vmem:[#allocation2 + $0x8] sm:$0xff] }
  0x36   : > { %846 = vmatpush3.bf16.msra.mxu0 %v953_v6 }
  0x37   : > { %847 = vmatprep.subr.bf16.mxu0 %v954_v7 }
  0x3a   : > { %848 = vmatpush3.bf16.msra.mxu0 %v955_v8 }
  0x3b   : > { %849 = vmatprep.subr.bf16.mxu0 %v956_v9 }
  0x3e   : > { %850 = vmatpush3.bf16.msra.mxu0 %v957_v10 }
  0x3f   : > { %851 = vmatprep.subr.bf16.mxu0 %v958_v11 }
  0x42   : > { %852 = vmatpush3.bf16.msra.mxu0 %v959_v17 }
  0x43   : > { %853 = vmatprep.subr.bf16.mxu0 %v960_v18 }
  0x46   : > { %854 = vmatpush3.bf16.msra.mxu0 %v961_v19 }
  0x47   : > { %855 = vmatprep.subr.bf16.mxu0 %v962_v20 }
  0x4a   : > { %856 = vmatpush3.bf16.msra.mxu0 %v963_v21 }
  0x4d   : > { %485 = vmatmul.mubr.bf16.vlgmr.msra.gmra.mrb[0].mxu0 %v322_v22 }
 0x120   : > { %v857_v24 = vpop.f32.mrb[0].mxu0 }
 0x121   : > { %v858_v25 = vpop.f32.mrb[1].mxu0 }
 0x122   : > { %v859_v26 = vadd.f32 %v858_v25, %v857_v24  ;;  %v860_v27 = vpop.f32.mrb[2].mxu0 }
 0x123   : > { %v861_v28 = vpop.f32.mrb[3].mxu0 }
 0x124   : > { %v862_v29 = vadd.f32 %v861_v28, %v860_v27 }
 0x126   : > { %v497_v30 = vpack.c.bf16 %v862_v29, %v859_v26 }
 0x128   : > { %866 = vmatpush3.bf16.msra.mxu1 %v497_v30 }
 0x12b   : > { %868 = vmatmul.mubr.msk.bf16.vlgmr.msra.gmra.mrb[0].mxu1 %vm503_vm2, %v964_v31 }
 0x1fe   : > { %v541_v33 = vpop.f32.mrb[0].mxu1 }
 0x1ff   : > { %v548_v35 = vadd.f32 %v541_v33, %v493_v32  ;;  %v869_v36 = vpop.f32.mrb[1].mxu1 }
 0x200   : > { %v544_v37 = vpop.f32.mrb[2].mxu1 }
 0x201   : > { %551 = vst.msk [vmem:[#allocation2] sm:$0xff] %vm550_vm3, %v548_v35  ;;  %v549_v38 = vadd.f32 %v544_v37, %v494_v34  ;;  %v870_v39 = vpop.f32.mrb[3].mxu1 }
 0x203   : > { %552 = vst.msk [vmem:[#allocation2 + $0x8] sm:$0xff] %vm550_vm3, %v549_v38 }
 0x204 PF: > { %p821_p4 = scmp.lt.s32.totalorder %s1055_s21, 1 }
 0x205   : > { %v965_v40 = vld [vmem:[%s1358_s2 + $0x4] ss:$8 sps:$4 sm:$0xff] (!%p821_p4)   ;;  %s822_s16 = sadd.s32 (!%p821_p4), 4294967295, %s1055_s21  ;;  %v967_v41 = vld [vmem:[%s1358_s2] ss:$8 sps:$4 sm:$0xff] (!%p821_p4)   ;;  %v1076_v42 = vmov (!%p821_p4), 0  }
 0x206   : > { %556 = sbr.rel (%p821_p4) target bundleno = 750 (0x2ee), region = 52  ;;  %654 = vmatprep.mubr.bf16.mxu0 (!%p821_p4), %v1076_v42  ;;  %s823_s27 = sshll.u32 (!%p821_p4), %s822_s16, 4  ;;  %622 = vmatprep.subr.bf16.mxu0 (!%p821_p4), %v965_v40  ;;  %v968_v43 = vld [vmem:[%s1358_s2 + $0x14] ss:$8 sps:$4 sm:$0xff] (!%p821_p4)   ;;  %v970_v44 = vld [vmem:[%s1358_s2 + $0x10] ss:$8 sps:$4 sm:$0xff] (!%p821_p4)  }
 0x207   : > { %623 = vmatpush1.bf16.msra.mxu0 (!%p821_p4), %v967_v41  ;;  %s562_s24 = scalar_lea.vmem (!%p821_p4), %s1360_s4, %s823_s27  ;;  %v971_v45 = vld [vmem:[%s1358_s2 + $0x24] ss:$8 sps:$4 sm:$0xff] (!%p821_p4)   ;;  %s559_s13 = scalar_lea.vmem (!%p821_p4), [#allocation2], %s823_s27  ;;  %v973_v50 = vld [vmem:[%s1358_s2 + $0x20] ss:$8 sps:$4 sm:$0xff] (!%p821_p4)   ;;  %vm618_vm4 = vcmask (!%p821_p4), 523264  }
 0x208   : > { %624 = vmatprep.subr.bf16.mxu0 (!%p821_p4), %v968_v43  ;;  %v563_v48 = vld [vmem:[%s562_s24] sm:$0xff] (!%p821_p4)  ;;  %v564_v49 = vld [vmem:[%s562_s24 + $0x8] sm:$0xff] (!%p821_p4)  ;;  %v974_v53 = vld [vmem:[%s1358_s2 + $0x34] ss:$8 sps:$4 sm:$0xff] (!%p821_p4)  }
 0x209   : > { %v976_v56 = vld [vmem:[%s1358_s2 + $0x30] ss:$8 sps:$4 sm:$0xff] (!%p821_p4)  }
 0x20a   : > { %v560_v46 = vld [vmem:[%s559_s13] sm:$0xff] (!%p821_p4)  ;;  %v561_v47 = vld [vmem:[%s559_s13 + $0x8] sm:$0xff] (!%p821_p4) }
 0x20b   : > { %625 = vmatpush1.bf16.msra.mxu0 (!%p821_p4), %v970_v44  ;;  %v565_v51 = vadd.f32 (!%p821_p4), %v563_v48, %v560_v46  ;;  %v566_v52 = vadd.f32 (!%p821_p4), %v564_v49, %v561_v47 }
 0x20c   : > { %626 = vmatprep.subr.bf16.mxu0 (!%p821_p4), %v971_v45 }
 0x20d   : > { %v567_v54 = vmax.f32 %v565_v51, 0.0  ;;  %v568_v55 = vmax.f32 %v566_v52, 0.0 }
 0x20f   : > { %627 = vmatpush1.bf16.msra.mxu0 %v973_v50  ;;  %v569_v57 = vpack.c.bf16 %v568_v55, %v567_v54 }
 0x210   : > { %628 = vmatprep.subr.bf16.mxu0 %v974_v53 }
 0x213   : > { %629 = vmatpush1.bf16.msra.mxu0 %v976_v56 }
 0x216   : > { %832 = vmatmul.mubr.msk.bf16.vlgmr.msra.gmra.mrb[0].mxu0 %vm618_vm4, %v569_v57 }
 0x2e9   : > { %v656_v58 = vpop.f32.mrb[0].mxu0 }
 0x2ea   : > { %665 = vst [vmem:[%s1198_s23] sm:$0xff] %v656_v58  ;;  %v658_v59 = vpop.f32.mrb[1].mxu0 }
 0x2eb   : > { %666 = vst [vmem:[%s1198_s23 + $0x8] sm:$0xff] %v658_v59  ;;  %v660_v60 = vpop.f32.mrb[2].mxu0 }
 0x2ec   : > { %667 = vst [vmem:[%s1198_s23 + $0x10] sm:$0xff] %v660_v60  ;;  %v662_v61 = vpop.f32.mrb[3].mxu0 }
 0x2ed   : > { %668 = vst [vmem:[%s1198_s23 + $0x18] sm:$0xff] %v662_v61 }
 0x2ee PF: > { %s840_s8 = sshll.u32 %s1055_s21, 2  ;;  %s836_s10 = sshll.u32 %s1059_s22, 3 }
 0x2ef   : > { %s686_s14 = sshll.u32 %s1198_s23, 4  ;;  %s683_s15 = sadd.s32 %s840_s8, %s836_s10  ;;  %s1295_s14 = int_to_ptr.vmem [resolvable:$true] %s686_s14 }
 0x2f0   : > { %s837_s12 = sshll.u32 %s683_s15, 7  ;;  %s1373_s13 = sand.u32 1, %s1047_s19  }
 0x2f1   : > { %s1300_s29 = scalar_lea.hbm %s1361_s5, %s837_s12  ;;  %s1304_s9 = scalar_lea.sflag [#allocation4], %s1373_s13 }
 0x2f2   : > { %s977_s16 = scalar_lea.vmem %s1295_s14, 512  ;;  %s1077_s21 = smov [#allocation3]  }
 0x2f3   : > { %p978_p5 = scmp.ne.s32.totalorder %s1295_s14, %s977_s16  ;;  %s981_s22 = sshll.u32 %s1077_s21, 4  ;;  %s982_s22 = int_to_ptr.vmem [resolvable:$false] %s981_s22 }
 0x2f4   : > { %s983_s23 = scalar_lea.vmem %s982_s22, 1024  ;;  %p984_p9 = scmp.lt.s32.totalorder %s1295_s14, %s982_s22 }
 0x2f5   : > { %p979_p6 = pnand %p978_p5, %p1161_p3  ;;  %p985_p10 = scmp.lt.s32.totalorder %s983_s23, %s977_s16 }
 0x2f7   : > { %p980_p7 = pneg %p979_p6  ;;  %p986_p11 = por %p985_p10, %p984_p9 }
 0x2f9   : > { %p987_p12 = pnand %p986_p11, %p980_p7 }
 0x2fb   : > { %990 = shalt.err (!%p987_p12)
}
 0x2fc   : > { %s991_s17 = scalar_lea.hbm %s1300_s29, 512  ;;  %s995_s30 = scalar_lea.hbm %s1361_s5, 2048 }
 0x2fd   : > { %p992_p13 = scmp.ne.s32.totalorder %s1300_s29, %s991_s17  ;;  %p996_p2 = scmp.lt.u32.totalorder %s1300_s29, %s1361_s5 }
 0x2fe   : > { %p997_p4 = scmp.lt.u32.totalorder %s995_s30, %s991_s17  ;;  %p999_p6 = scmp.lt.u32.totalorder %s991_s17, %s1300_s29 }
 0x2ff   : > { %p993_p0 = pnand %p992_p13, %p1161_p3 }
 0x300   : > { %p998_p5 = por %p997_p4, %p996_p2 }
 0x301   : > { %p994_p1 = pneg %p993_p0 }
 0x302   : > { %p1000_p7 = por %p999_p6, %p998_p5 }
 0x304   : > { %p1001_p9 = pnand %p1000_p7, %p994_p1 }
 0x306   : > { %1004 = shalt.err (!%p1001_p9)
}
 0x307   : > { %s1078_s15 = smov 256   ;;  %s1079_s12 = smov 16  }
 0x308   : > { %871 = dma.vmem_to_hbm [thread:$0]  (%p1161_p3), %s1295_s14, 512, %s1300_s29, %s1304_s9, %s1078_s15, %s1078_s15, %s1079_s12  }
 0x309 PF: > { %p877_p10 = scmp.ge.s32.totalorder %s1071_s25, 2  ;;  %s701_s24 = sand.u32 1, %s1043_s18  }
 0x30a   : > { %s702_s28 = scalar_lea.sflag [#allocation4], %s701_s24 }
 0x30b   : > { %p874_p11 = pnand %p877_p10, %p1170_p8 }
 0x30d   : > { %1038 = dma.done.wait (!%p874_p11), %s702_s28, 512  }
 0x30e   : > { %1040 = vsyncadd (!%p874_p11), %s702_s28, 4294966784  ;;  %s18_s25 = sadd.s32 1, %s1071_s25   ;;  %s1374_s21 = sld [smem:[#allocation6_spill]] }
 0x30f   : > { %p15_p12 = scmp.ge.s32.totalorder %s18_s25, 6   ;;  %s1375_s22 = sld [smem:[#allocation7_spill]] }
 0x310   : > { %s1376_s23 = sld [smem:[#allocation8_spill]]  ;;  %s1377_s24 = sld [smem:[#allocation9_spill]] }
 0x311   : > { %s1378_s18 = smov %s1047_s19  ;;  %s1379_s19 = smov %s1051_s20 }
 0x312   : > { %s1380_s20 = smov %s1179_s11  ;;  %17 = sbr.rel (!%p15_p12) target bundleno = 5 (0x5), region = 92 }
 0x319   :  { %707 = vsyncpa [#allocation4], 1 }
 0x31a   :  { %709 = vsyncpa [#allocation4 + $0x1], 1 }

</bundles_post_ra>
